<compile_context>
chip_gen: v7x
topology: tpu7x:2x2x1
jax: 0.10.0
libtpu: 0.0.40
codegen_flags: <defaults>
</compile_context>

<pallas_src>
import math
import functools

import jax
import jax.numpy as jnp
from jax.experimental import pallas as pl
from jax.experimental.pallas import tpu as pltpu


_GELU_C = math.sqrt(2.0 / math.pi)


def _new_gelu(x):
    # NewGELUActivation: 0.5*x*(1+tanh(sqrt(2/pi)*(x + 0.044715*x^3)))
    # x*x*x (not jnp.power) so it stays VPU multiplies; tanh goes to the EUP.
    return 0.5 * x * (1.0 + jnp.tanh(_GELU_C * (x + 0.044715 * (x * x * x))))


def _mlp_kernel(compute_dtype, x_ref, w1_ref, b1_ref, w2_ref, b2_ref, o_ref,
                acc_ref):
    k = pl.program_id(1)

    @pl.when(k == 0)
    def _init():
        acc_ref[...] = jnp.zeros_like(acc_ref)

    x = x_ref[...].astype(compute_dtype)                              # (T, D)

    # Linear 1 (this I-tile): MXU matmul, f32 accumulation, f32 bias + GELU.
    h = jnp.dot(x, w1_ref[...], preferred_element_type=jnp.float32)   # (T, tI)
    h = _new_gelu(h + b1_ref[...])

    # Linear 2 partial product, accumulated over the "arbitrary" I grid axis.
    acc_ref[...] += jnp.dot(h.astype(compute_dtype), w2_ref[...],
                            preferred_element_type=jnp.float32)       # (T, D)

    @pl.when(k == pl.num_programs(1) - 1)
    def _finalize():
        # TODO(synk): hidden dropout omitted (eval-mode identity).
        o_ref[...] = (acc_ref[...] + b2_ref[...]).astype(o_ref.dtype)


def prepare_mlp_params(w1, b1, w2, b2, compute_dtype=jnp.bfloat16):
    """One-time parameter prep: cast weights to the MXU compute dtype and keep
    biases in f32 (row vectors).  Do this at load time, not per forward."""
    compute_dtype = jnp.dtype(compute_dtype)
    return (w1.astype(compute_dtype),
            jnp.asarray(b1, jnp.float32).reshape(1, -1),
            w2.astype(compute_dtype),
            jnp.asarray(b2, jnp.float32).reshape(1, -1))


def _pick_i_tile(I, requested):
    """Largest lane-aligned divisor of I that is <= requested (else I)."""
    if I <= requested:
        return I
    best = None
    d = 128
    while d <= requested:
        if I % d == 0:
            best = d
        d += 128
    return best if best is not None else I


def mlp_forward(x, w1, b1, w2, b2, *, compute_dtype=jnp.bfloat16,
                row_tile=256, i_tile=512):
    """x: (..., D); w1: (D, I); b1: (I,)|(1,I); w2: (I, D); b2: (D,)|(1,D)."""
    orig_shape = x.shape
    D = orig_shape[-1]
    I = w1.shape[-1]
    rows = math.prod(orig_shape[:-1]) if len(orig_shape) > 1 else 1
    x2 = x.reshape(rows, D)

    compute_dtype = jnp.dtype(compute_dtype)
    # Fallback casts only fire if prepare_mlp_params wasn't used (avoid per-call
    # HBM cast traffic in production by pre-casting once).
    if w1.dtype != compute_dtype:
        w1 = w1.astype(compute_dtype)
    if w2.dtype != compute_dtype:
        w2 = w2.astype(compute_dtype)
    b1f = jnp.asarray(b1, jnp.float32).reshape(1, I)
    b2f = jnp.asarray(b2, jnp.float32).reshape(1, D)

    # --- row tiling (parallel axis) -------------------------------------
    tile = min(row_tile, rows)
    tile = max(8, ((tile + 7) // 8) * 8)
    if pl.cdiv(rows, tile) == 1 and rows > 8:
        # Guarantee >=2 parallel steps so both v7x TensorCores get work.
        tile = max(8, ((((rows + 1) // 2) + 7) // 8) * 8)
    row_grid = pl.cdiv(rows, tile)   # partial last block OK: rows independent

    # --- intermediate (I) tiling (arbitrary / reduction axis, last) -----
    ti = _pick_i_tile(I, i_tile)
    i_grid = I // ti

    # Single-buffer blocks whose index never changes across the grid.
    inv = pl.Buffered(1)
    w_mode = inv if i_grid == 1 else None   # W1/b1/W2 vary with k when tiled

    grid = (row_grid, i_grid)

    # --- VMEM budget, capped per generation with ~15% headroom ----------
    cbytes = compute_dtype.itemsize
    xbytes = x.dtype.itemsize
    wbuf = 1 if i_grid == 1 else 2
    est = (2 * tile * D * xbytes            # x row tile (double-buffered)
           + 2 * tile * D * xbytes          # output tile (double-buffered)
           + wbuf * D * ti * cbytes         # W1 tile(s)
           + wbuf * ti * 4                  # b1 tile(s)
           + wbuf * ti * D * cbytes         # W2 tile(s)
           + D * 4                          # b2 (single-buffered)
           + tile * D * 4                   # f32 accumulator scratch
           + tile * ti * (4 + cbytes))      # h intermediate (f32 + cast copy)
    try:
        cap = int(pltpu.get_tpu_info().vmem_capacity_bytes * 0.85)
    except Exception:
        cap = 54 * 1024 * 1024              # conservative (v7x-safe) fallback
    vmem_limit = max(16 * 1024 * 1024, min(int(est * 1.3) + (4 << 20), cap))

    out = pl.pallas_call(
        functools.partial(_mlp_kernel, compute_dtype),
        out_shape=jax.ShapeDtypeStruct((rows, D), x.dtype),
        grid_spec=pltpu.PrefetchScalarGridSpec(
            num_scalar_prefetch=0,
            grid=grid,
            in_specs=[
                pl.BlockSpec((tile, D), lambda i, k: (i, 0)),              # x
                pl.BlockSpec((D, ti), lambda i, k: (0, k),
                             pipeline_mode=w_mode),                        # W1
                pl.BlockSpec((1, ti), lambda i, k: (0, k),
                             pipeline_mode=w_mode),                        # b1
                pl.BlockSpec((ti, D), lambda i, k: (k, 0),
                             pipeline_mode=w_mode),                        # W2
                pl.BlockSpec((1, D), lambda i, k: (0, 0),
                             pipeline_mode=inv),                           # b2
            ],
            out_specs=pl.BlockSpec((tile, D), lambda i, k: (i, 0)),
            scratch_shapes=[pltpu.VMEM((tile, D), jnp.float32)],
        ),
        compiler_params=pltpu.CompilerParams(
            dimension_semantics=("parallel", "arbitrary"),
            vmem_limit_bytes=vmem_limit,
        ),
    )(x2, w1, b1f, w2, b2f)

    return out.reshape(orig_shape)


def _reference_mlp(x, w1, b1, w2, b2):
    """Pure-JAX reference (mirrors the PyTorch MLP in eval mode)."""
    h = x @ w1 + b1
    h = 0.5 * h * (1.0 + jnp.tanh(math.sqrt(2.0 / math.pi)
                                  * (h + 0.044715 * h ** 3)))
    return h @ w2 + b2


if __name__ == "__main__":
    key = jax.random.PRNGKey(0)

    def make(k, B, S, D, I):
        ks = jax.random.split(k, 5)
        scale = 0.02
        x = jax.random.normal(ks[0], (B, S, D), jnp.float32)
        w1 = scale * jax.random.normal(ks[1], (D, I), jnp.float32)
        b1 = scale * jax.random.normal(ks[2], (I,), jnp.float32)
        w2 = scale * jax.random.normal(ks[3], (I, D), jnp.float32)
        b2 = scale * jax.random.normal(ks[4], (D,), jnp.float32)
        return x, w1, b1, w2, b2

    k1, k2 = jax.random.split(key)

    # Config A: toy module config (batch=2, seq=8, hidden=32, intermediate=64),
    # exact f32 path, single I-tile (weights single-buffered), 2 row tiles.
    xa, w1a, b1a, w2a, b2a = make(k1, 2, 8, 32, 64)
    pa = prepare_mlp_params(w1a, b1a, w2a, b2a, compute_dtype=jnp.float32)
    out_a = jax.block_until_ready(
        mlp_forward(xa, *pa, compute_dtype=jnp.float32))
    ref_a = _reference_mlp(xa, w1a, b1a, w2a, b2a)
    assert out_a.shape == xa.shape
    assert jnp.max(jnp.abs(out_a - ref_a)) < 1e-4, "f32 mismatch vs reference"

    # Config B: lane-dense shapes (hidden=128, intermediate=512), default bf16
    # MXU operands, I tiled (i_grid=2) to exercise the accumulator path.
    xb, w1b, b1b, w2b, b2b = make(k2, 4, 64, 128, 512)
    pb = prepare_mlp_params(w1b, b1b, w2b, b2b, compute_dtype=jnp.bfloat16)
    out_b = jax.block_until_ready(
        mlp_forward(xb, *pb, row_tile=128, i_tile=256))
    ref_b = _reference_mlp(xb, w1b, b1b, w2b, b2b)
    assert out_b.shape == xb.shape
    assert jnp.max(jnp.abs(out_b - ref_b)) < 5e-2, "bf16 mismatch vs reference"

    print("KERNEL_OK")
</pallas_src>

<mosaic_0001>
module attributes {stable_mosaic.version = 11 : i64} {
  func.func @_mlp_kernel(%arg0: i32, %arg1: i32, %arg2: memref<8x32xf32, #tpu.memory_space<vmem>>, %arg3: memref<32x64xf32, #tpu.memory_space<vmem>>, %arg4: memref<1x64xf32, #tpu.memory_space<vmem>>, %arg5: memref<64x32xf32, #tpu.memory_space<vmem>>, %arg6: memref<1x32xf32, #tpu.memory_space<vmem>>, %arg7: memref<8x32xf32, #tpu.memory_space<vmem>>, %arg8: memref<8x32xf32, #tpu.memory_space<vmem>>) attributes {dimension_semantics = [#tpu.dimension_semantics<parallel>, #tpu.dimension_semantics<arbitrary>], iteration_bounds = array<i64: 2, 1>, scalar_prefetch = 0 : i64, scratch_operands = 1 : i64, tpu.core_type = #tpu.core_type<tc>, window_params = [{transform_indices = @transform_0, window_bounds = array<i64: 8, 32>}, {pipeline_mode = #tpu.pipeline_mode<synchronous>, transform_indices = @transform_1, window_bounds = array<i64: 32, 64>}, {pipeline_mode = #tpu.pipeline_mode<synchronous>, transform_indices = @transform_2, window_bounds = array<i64: 1, 64>}, {pipeline_mode = #tpu.pipeline_mode<synchronous>, transform_indices = @transform_3, window_bounds = array<i64: 64, 32>}, {pipeline_mode = #tpu.pipeline_mode<synchronous>, transform_indices = @transform_4, window_bounds = array<i64: 1, 32>}, {transform_indices = @transform_5, window_bounds = array<i64: 8, 32>}]} {
    %c0_i32 = arith.constant 0 : i32
    %0 = arith.cmpi eq, %arg1, %c0_i32 : i32
    %1 = arith.extui %0 : i1 to i32
    %c0_i32_0 = arith.constant 0 : i32
    %2 = arith.cmpi ne, %1, %c0_i32_0 : i32
    scf.if %2 {
      %cst_19 = arith.constant 0.000000e+00 : f32
      %30 = vector.broadcast %cst_19 : f32 to vector<8x32xf32>
      %c0_20 = arith.constant 0 : index
      %c0_21 = arith.constant 0 : index
      %31 = vector.load %arg8[%c0_20, %c0_21] : memref<8x32xf32, #tpu.memory_space<vmem>>, vector<8x32xf32>
      tpu.vector_store %arg8[%c0_20, %c0_21], %30 {strides = array<i32>} : memref<8x32xf32, #tpu.memory_space<vmem>>, vector<8x32xf32>,
    } else {
    }
    %c0 = arith.constant 0 : index
    %c0_1 = arith.constant 0 : index
    %3 = vector.load %arg2[%c0, %c0_1] : memref<8x32xf32, #tpu.memory_space<vmem>>, vector<8x32xf32>
    %c0_2 = arith.constant 0 : index
    %c0_3 = arith.constant 0 : index
    %4 = vector.load %arg3[%c0_2, %c0_3] : memref<32x64xf32, #tpu.memory_space<vmem>>, vector<32x64xf32>
    %cst = arith.constant dense<0.000000e+00> : vector<8x64xf32>
    %5 = tpu.matmul %3, %4, %cst {dimension_numbers = #tpu.dot_dimension_numbers<[1], [0], [0], [1], [0, 0, 1, 1], [], []>} : vector<8x32xf32>, vector<32x64xf32>, vector<8x64xf32> -> vector<8x64xf32>
    %c0_4 = arith.constant 0 : index
    %c0_5 = arith.constant 0 : index
    %6 = vector.load %arg4[%c0_4, %c0_5] : memref<1x64xf32, #tpu.memory_space<vmem>>, vector<1x64xf32>
    %7 = vector.broadcast %6 : vector<1x64xf32> to vector<8x64xf32>
    %8 = arith.addf %5, %7 : vector<8x64xf32>
    %cst_6 = arith.constant 5.000000e-01 : f32
    %9 = vector.broadcast %cst_6 : f32 to vector<8x64xf32>
    %10 = arith.mulf %9, %8 : vector<8x64xf32>
    %11 = arith.mulf %8, %8 : vector<8x64xf32>
    %12 = arith.mulf %11, %8 : vector<8x64xf32>
    %cst_7 = arith.constant 4.471500e-02 : f32
    %13 = vector.broadcast %cst_7 : f32 to vector<8x64xf32>
    %14 = arith.mulf %13, %12 : vector<8x64xf32>
    %15 = arith.addf %8, %14 : vector<8x64xf32>
    %cst_8 = arith.constant 0.797884583 : f32
    %16 = vector.broadcast %cst_8 : f32 to vector<8x64xf32>
    %17 = arith.mulf %16, %15 : vector<8x64xf32>
    %18 = math.tanh %17 : vector<8x64xf32>
    %cst_9 = arith.constant 1.000000e+00 : f32
    %19 = vector.broadcast %cst_9 : f32 to vector<8x64xf32>
    %20 = arith.addf %19, %18 : vector<8x64xf32>
    %21 = arith.mulf %10, %20 : vector<8x64xf32>
    %c0_10 = arith.constant 0 : index
    %c0_11 = arith.constant 0 : index
    %22 = vector.load %arg8[%c0_10, %c0_11] : memref<8x32xf32, #tpu.memory_space<vmem>>, vector<8x32xf32>
    %c0_12 = arith.constant 0 : index
    %c0_13 = arith.constant 0 : index
    %23 = vector.load %arg5[%c0_12, %c0_13] : memref<64x32xf32, #tpu.memory_space<vmem>>, vector<64x32xf32>
    %cst_14 = arith.constant dense<0.000000e+00> : vector<8x32xf32>
    %24 = tpu.matmul %21, %23, %cst_14 {dimension_numbers = #tpu.dot_dimension_numbers<[1], [0], [0], [1], [0, 0, 1, 1], [], []>} : vector<8x64xf32>, vector<64x32xf32>, vector<8x32xf32> -> vector<8x32xf32>
    %25 = arith.addf %22, %24 : vector<8x32xf32>
    %c0_15 = arith.constant 0 : index
    %c0_16 = arith.constant 0 : index
    %26 = vector.load %arg8[%c0_15, %c0_16] : memref<8x32xf32, #tpu.memory_space<vmem>>, vector<8x32xf32>
    tpu.vector_store %arg8[%c0_15, %c0_16], %25 {strides = array<i32>} : memref<8x32xf32, #tpu.memory_space<vmem>>, vector<8x32xf32>,
    %c0_i32_17 = arith.constant 0 : i32
    %27 = arith.cmpi eq, %arg1, %c0_i32_17 : i32
    %28 = arith.extui %27 : i1 to i32
    %c0_i32_18 = arith.constant 0 : i32
    %29 = arith.cmpi ne, %28, %c0_i32_18 : i32
    scf.if %29 {
      %c0_19 = arith.constant 0 : index
      %c0_20 = arith.constant 0 : index
      %30 = vector.load %arg8[%c0_19, %c0_20] : memref<8x32xf32, #tpu.memory_space<vmem>>, vector<8x32xf32>
      %c0_21 = arith.constant 0 : index
      %c0_22 = arith.constant 0 : index
      %31 = vector.load %arg6[%c0_21, %c0_22] : memref<1x32xf32, #tpu.memory_space<vmem>>, vector<1x32xf32>
      %32 = vector.broadcast %31 : vector<1x32xf32> to vector<8x32xf32>
      %33 = arith.addf %30, %32 : vector<8x32xf32>
      %c0_23 = arith.constant 0 : index
      %c0_24 = arith.constant 0 : index
      %34 = vector.load %arg7[%c0_23, %c0_24] : memref<8x32xf32, #tpu.memory_space<vmem>>, vector<8x32xf32>
      tpu.vector_store %arg7[%c0_23, %c0_24], %33 {strides = array<i32>} : memref<8x32xf32, #tpu.memory_space<vmem>>, vector<8x32xf32>,
    } else {
    }
    return
  }
  func.func @transform_0(%arg0: i32, %arg1: i32) -> (i32, i32) {
    %c0_i32 = arith.constant 0 : i32
    %c0_i32_0 = arith.constant 0 : i32
    return %arg0, %c0_i32 : i32, i32
  }
  func.func @transform_1(%arg0: i32, %arg1: i32) -> (i32, i32) {
    %c0_i32 = arith.constant 0 : i32
    %c0_i32_0 = arith.constant 0 : i32
    return %c0_i32, %arg1 : i32, i32
  }
  func.func @transform_2(%arg0: i32, %arg1: i32) -> (i32, i32) {
    %c0_i32 = arith.constant 0 : i32
    %c0_i32_0 = arith.constant 0 : i32
    return %c0_i32, %arg1 : i32, i32
  }
  func.func @transform_3(%arg0: i32, %arg1: i32) -> (i32, i32) {
    %c0_i32 = arith.constant 0 : i32
    %c0_i32_0 = arith.constant 0 : i32
    return %arg1, %c0_i32 : i32, i32
  }
  func.func @transform_4(%arg0: i32, %arg1: i32) -> (i32, i32) {
    %c0_i32 = arith.constant 0 : i32
    %c0_i32_0 = arith.constant 0 : i32
    %c0_i32_1 = arith.constant 0 : i32
    return %c0_i32, %c0_i32_0 : i32, i32
  }
  func.func @transform_5(%arg0: i32, %arg1: i32) -> (i32, i32) {
    %c0_i32 = arith.constant 0 : i32
    %c0_i32_0 = arith.constant 0 : i32
    return %arg0, %c0_i32 : i32, i32
  }
}

</mosaic_0001>

<bundles_post_ra>
// kernel: tpu_custom_call.1
= control target key start
LH: loop header
LB: loop body
LE: loop exit
PB: predicated region body
PF: predicated region fallthrough
CT: control target
= control target key end

     0   :  { %10 = vsyncpa [#allocation4], 0  ;;  %s1019_s0 = inlined_call_operand.vmem [shape: f32[16,32], index: 0, kind: input, shape index: {}]   ;;  %s1020_s1 = inlined_call_operand.vmem [shape: f32[32,64], index: 1, kind: input, shape index: {}]   ;;  %s1021_s2 = inlined_call_operand.vmem [shape: f32[1,64], index: 2, kind: input, shape index: {}]   ;;  %s1022_s3 = inlined_call_operand.vmem [shape: f32[64,32], index: 3, kind: input, shape index: {}]   ;;  %s1023_s4 = inlined_call_operand.vmem [shape: f32[1,32], index: 4, kind: input, shape index: {}]   ;;  %s1024_s5 = inlined_call_operand.hbm [shape: f32[16,32], index: 5, kind: output, shape index: {}]  }
   0x1   :  { %12 = vsyncpa [#allocation4 + $0x1], 0  ;;  %s861_s18 = smov 0   ;;  %s863_s19 = smov 0  }
   0x2   :  { %s865_s20 = smov 0   ;;  %s867_s21 = smov 0  }
   0x3   :  { %s869_s22 = smov 0   ;;  %s871_s23 = smov 0  }
   0x4 LB: > { %s607_s24 = sadd.s32 4294967295, %s825_s23   ;;  %s608_s25 = sadd.s32 4294967294, %s825_s23   ;;  %s825_s23 = sphi %s871_s23, %s18_s23   ;;  %s821_s22 = sphi %s869_s22, %s1031_s22   ;;  %s817_s21 = sphi %s867_s21, %s1030_s21   ;;  %s813_s20 = sphi %s865_s20, %s1029_s20   ;;  %s809_s19 = sphi %s863_s19, %s1028_s19   ;;  %s805_s18 = sphi %s861_s18, %s1027_s18  }
   0x5   : > { %s30_s26 = sadd.s32 1, %s821_s22  ;;  %s162_s27 = sadd.s32 1, %s813_s20 }
   0x6   : > { %p32_p0 = scmp.ge.s32.totalorder %s30_s26, 2  ;;  %p172_p1 = scmp.ne.s32.totalorder %s813_s20, %s809_s19 }
   0x7   : > { %p173_p2 = scmp.eq.s32.totalorder %s607_s24, 1  ;;  %p178_p3 = scmp.ne.s32.totalorder %s809_s19, %s805_s18 }
   0x8   : > { %s1033_s26 = smov (%p32_p0, %s30_s26), 0  ;;  %p179_p5 = scmp.eq.s32.totalorder %s608_s25, 1 }
   0x9   : > { %p901_p4 = por %p173_p2, %p172_p1  ;;  %s159_s29 = ssub.s32 %s821_s22, %s1033_s26 }
   0xa   : > { %p614_p6 = scmp.ge.s32.totalorder %s825_s23, 1  ;;  %p160_p7 = scmp.eq.s32.totalorder %s159_s29, 0 }
   0xb   : > { %p908_p8 = por %p179_p5, %p178_p3  ;;  %p229_p9 = scmp.lt.s32.totalorder %s825_s23, 3 }
   0xc   : > { %s914_s6 = scalar_select %p160_p7, %s813_s20, %s162_s27  }
   0xd   : > { %p230_p10 = pnand %p614_p6, %p229_p9 }
   0xe   : > { %v292_v0 = vld [vmem:[%s1020_s1] sm:$0xff] (!%p230_p10)  ;;  %v293_v1 = vld [vmem:[%s1020_s1 + $0x8] sm:$0xff] (!%p230_p10)  ;;  %v294_v2 = vld [vmem:[%s1020_s1 + $0x10] sm:$0xff] (!%p230_p10)  ;;  %v827_v3 = vmov (!%p230_p10), 0.0|0.0   ;;  %vm828_vm0 = vmmov (!%p230_p10), 0   ;;  %v829_v6 = vmov (!%p230_p10), 0.0  }
   0xf   : > { %233 = sbr.rel (%p230_p10) target bundleno = 504 (0x1f8), region = 40  ;;  %669 = vmatprep.subr.bf16.mxu0 (!%p230_p10), %v827_v3  ;;  %v670_v4 = vpack.c.bf16 (!%p230_p10), %v293_v1, %v292_v0  ;;  %v295_v5 = vld [vmem:[%s1020_s1 + $0x18] sm:$0xff] (!%p230_p10)  ;;  %647 = vmatprep.mubr.msk.f32.mxu0 (!%p230_p10), %vm828_vm0, %v829_v6  ;;  %p268_p11 = scmp.lt.s32.totalorder (!%p230_p10), %s817_s21, 1  ;;  %vm289_vm1 = vcmask (!%p230_p10), 261120   ;;  %v387_v9 = vld [vmem:[%s1022_s3] sm:$0xff] (!%p230_p10)  ;;  %v388_v10 = vld [vmem:[%s1022_s3 + $0x8] sm:$0xff] (!%p230_p10) }
  0x10   : > { %290 = vst.msk [vmem:[#allocation2] sm:$0xff] (!%p230_p10), %vm289_vm1, %v829_v6  ;;  %675 = vmatprep.subr.bf16.mxu1 (!%p230_p10), %v827_v3  ;;  %666 = vmatprep.mubr.msk.f32.mxu1 (!%p230_p10), %vm828_vm0, %v829_v6  ;;  %v673_v7 = vpack.c.bf16 (!%p230_p10), %v295_v5, %v294_v2  ;;  %v676_v11 = vpack.c.bf16 (!%p230_p10), %v388_v10, %v387_v9  ;;  %v389_v12 = vld [vmem:[%s1022_s3 + $0x10] sm:$0xff] (!%p230_p10)  ;;  %v390_v13 = vld [vmem:[%s1022_s3 + $0x18] sm:$0xff] (!%p230_p10)  ;;  %v391_v15 = vld [vmem:[%s1022_s3 + $0x20] sm:$0xff] (!%p230_p10)  ;;  %vm395_vm2 = vcmask (!%p230_p10), 523264   ;;  %s265_s8 = sand.u32 (!%p230_p10), 1, %s809_s19  }
  0x11   : > { %671 = vmatpush3.bf16.msra.mxu0 (!%p230_p10), %v670_v4  ;;  %v679_v14 = vpack.c.bf16 (!%p230_p10), %v390_v13, %v389_v12  ;;  %v392_v16 = vld [vmem:[%s1022_s3 + $0x28] sm:$0xff] (!%p230_p10)  ;;  %v393_v18 = vld [vmem:[%s1022_s3 + $0x30] sm:$0xff] (!%p230_p10)  ;;  %v394_v19 = vld [vmem:[%s1022_s3 + $0x38] sm:$0xff] (!%p230_p10)  ;;  %s615_s9 = sshll.u32 (!%p230_p10), %s265_s8, 3  ;;  %s622_s12 = sshll.u32 (!%p230_p10), %s817_s21, 7 }
  0x12   : > { %672 = vmatprep.subr.bf16.mxu0 (!%p230_p10), %v827_v3  ;;  %677 = vmatpush3.bf16.msra.mxu1 (!%p230_p10), %v676_v11  ;;  %v682_v17 = vpack.c.bf16 (!%p230_p10), %v392_v16, %v391_v15  ;;  %v685_v20 = vpack.c.bf16 (!%p230_p10), %v394_v19, %v393_v18  ;;  %v617_v21 = vld [vmem:[%s1021_s2] ss:$0 sm:$0xff] (!%p230_p10)  ;;  %s267_s13 = scalar_lea.vmem (!%p230_p10), [#allocation3], %s615_s9  ;;  %s971_s17 = scalar_lea.hbm (!%p230_p10), %s1024_s5, %s622_s12 }
  0x13   : > { %678 = vmatprep.subr.bf16.mxu1 (!%p230_p10), %v827_v3  ;;  %v620_v38 = vld [vmem:[%s1023_s4] ss:$0 sm:$0xff] (!%p230_p10)  ;;  %s498_s14 = sshll.u32 (!%p230_p10), %s267_s13, 4  ;;  %s485_s24 = scalar_lea.sflag (!%p230_p10), [#allocation4], %s265_s8  ;;  %s973_s14 = int_to_ptr.vmem [resolvable:$true] %s498_s14 }
  0x15   : > { %674 = vmatpush3.bf16.msra.mxu0 (!%p230_p10), %v673_v7 }
  0x16   : > { %s269_s15 = scalar_select %p268_p11, %s817_s21, 1  ;;  %680 = vmatpush3.bf16.msra.mxu1 %v679_v14 }
  0x17   : > { %681 = vmatprep.subr.bf16.mxu1 %v827_v3  ;;  %v386_v34 = vld [vmem:[#allocation2] sm:$0xff]  ;;  %s830_s21 = smov [#allocation3]  }
  0x18   : > { %s616_s16 = sshll.u32 %s269_s15, 3  ;;  %s751_s27 = sshll.u32 %s830_s21, 4  ;;  %s752_s27 = int_to_ptr.vmem [resolvable:$false] %s751_s27 }
  0x19   : > { %s271_s25 = scalar_lea.vmem %s1019_s0, %s616_s16  ;;  %s753_s29 = scalar_lea.vmem %s752_s27, 256 }
  0x1a   : > { %v291_v8 = vld [vmem:[%s271_s25] sm:$0xff]  ;;  %683 = vmatpush3.bf16.msra.mxu1 %v682_v17  ;;  %s747_s25 = scalar_lea.vmem %s973_s14, 128  ;;  %p754_p1 = scmp.lt.s32.totalorder %s973_s14, %s752_s27 }
  0x1b   : > { %648 = vmatmul.mubr.msk.f32.vlgmr.msra.gmra.mrb[0].mxu0 %vm289_vm1, %v291_v8  ;;  %684 = vmatprep.subr.bf16.mxu1 %v827_v3  ;;  %p748_p12 = scmp.ne.s32.totalorder %s973_s14, %s747_s25  ;;  %p755_p2 = scmp.lt.s32.totalorder %s753_s29, %s747_s25 }
  0x1d   : > { %p749_p13 = pnand %p748_p12, %p901_p4  ;;  %p756_p3 = por %p755_p2, %p754_p1 }
  0x1e   : > { %686 = vmatpush3.bf16.msra.mxu1 %v685_v20 }
  0x1f   : > { %p750_p0 = pneg %p749_p13 }
  0x21   : > { %p757_p5 = pnand %p756_p3, %p750_p0 }
  0xee   : > { %v373_v22 = vpop.f32.mrb[0].mxu0 }
  0xef   : > { %v374_v23 = vadd.f32 %v617_v21, %v373_v22  ;;  %v649_v24 = vpop.f32.mrb[1].mxu0 }
  0xf1   : > { %v378_v25 = vmul.f32 %v374_v23, %v374_v23  ;;  %v377_v31 = vmul.f32 0.5, %v374_v23 }
  0xf3   : > { %v379_v26 = vmul.f32 %v378_v25, %v374_v23 }
  0xf5   : > { %v380_v27 = vmul.f32 0.044715, %v379_v26 }
  0xf7   : > { %v381_v28 = vadd.f32 %v380_v27, %v374_v23 }
  0xf9   : > { %v382_v29 = vmul.f32 0.7978846, %v381_v28 }
  0xfb   : > { %745 = vtanh.f32 %v382_v29 }
 0x105   : > { %v746_v30 = vpop.eup %745 }
 0x106   : > { %v384_v32 = vadd.f32 1.0, %v746_v30 }
 0x108   : > { %v385_v33 = vmul.f32 %v384_v32, %v377_v31 }
 0x10a   : > { %667 = vmatmul.mubr.msk.f32.vlgmr.msra.gmra.mrb[0].mxu1 %vm395_vm2, %v385_v33 }
 0x1dd   : > { %v465_v35 = vpop.f32.mrb[0].mxu1 }
 0x1de   : > { %v469_v36 = vadd.f32 %v465_v35, %v386_v34  ;;  %v668_v37 = vpop.f32.mrb[1].mxu1 }
 0x1e0   : > { %470 = vst.msk [vmem:[#allocation2] sm:$0xff] %vm289_vm1, %v469_v36 }
 0x1e7   : > { %v474_v39 = vld [vmem:[#allocation2] sm:$0xff] }
 0x1e8   : > { %v482_v40 = vadd.f32 %v620_v38, %v474_v39 }
 0x1ea   : > { %483 = vst.msk [vmem:[%s267_s13] sm:$0xff] %vm289_vm1, %v482_v40 }
 0x1eb   : > { %760 = shalt.err (!%p757_p5)
}
 0x1ec   : > { %s761_s7 = scalar_lea.hbm %s971_s17, 128  ;;  %s765_s10 = scalar_lea.hbm %s1024_s5, 256 }
 0x1ed   : > { %p762_p6 = scmp.ne.s32.totalorder %s971_s17, %s761_s7  ;;  %p766_p10 = scmp.lt.u32.totalorder %s971_s17, %s1024_s5 }
 0x1ee   : > { %p767_p11 = scmp.lt.u32.totalorder %s765_s10, %s761_s7  ;;  %p769_p13 = scmp.lt.u32.totalorder %s761_s7, %s971_s17 }
 0x1ef   : > { %p763_p7 = pnand %p762_p6, %p901_p4 }
 0x1f0   : > { %p768_p12 = por %p767_p11, %p766_p10 }
 0x1f1   : > { %p764_p9 = pneg %p763_p7 }
 0x1f2   : > { %p770_p0 = por %p769_p13, %p768_p12 }
 0x1f4   : > { %p771_p1 = pnand %p770_p0, %p764_p9 }
 0x1f6   : > { %774 = shalt.err (!%p771_p1)
}
 0x1f7   : > { %687 = dma.vmem_to_hbm [thread:$0]  (%p901_p4), %s973_s14, 128, %s971_s17, %s485_s24  }
 0x1f8 PF: > { %p693_p2 = scmp.ge.s32.totalorder %s825_s23, 2  ;;  %s510_s13 = sand.u32 1, %s805_s18  }
 0x1f9   : > { %s511_s15 = scalar_lea.sflag [#allocation4], %s510_s13 }
 0x1fa   : > { %p690_p3 = pnand %p693_p2, %p908_p8 }
 0x1fc   : > { %800 = dma.done.wait (!%p690_p3), %s511_s15, 128  }
 0x1fd   : > { %802 = vsyncadd (!%p690_p3), %s511_s15, 4294967168  ;;  %s18_s23 = sadd.s32 1, %s825_s23   ;;  %s1027_s18 = smov %s809_s19 }
 0x1fe   : > { %p15_p5 = scmp.ge.s32.totalorder %s18_s23, 4   ;;  %s1028_s19 = smov %s813_s20 }
 0x1ff   : > { %s1029_s20 = smov %s914_s6  ;;  %s1030_s21 = smov %s821_s22 }
 0x200   : > { %s1031_s22 = smov %s1033_s26  ;;  %17 = sbr.rel (!%p15_p5) target bundleno = 4 (0x4), region = 92 }
 0x207   :  { %516 = vsyncpa [#allocation4], 1 }
 0x208   :  { %518 = vsyncpa [#allocation4 + $0x1], 1 }

</bundles_post_ra>
